<compile_context>
chip_gen: v7x
topology: tpu7x:2x2x1
jax: 0.10.0
libtpu: 0.0.40
codegen_flags: <defaults>
</compile_context>

<pallas_src>
import functools
import math

import jax
import jax.numpy as jnp
from jax import lax
from jax.experimental import pallas as pl
from jax.experimental.pallas import tpu as pltpu

LOG_SIG_MAX = 2.0
LOG_SIG_MIN = -20.0
_EPS = 1e-6
_HALF_LOG_2PI = 0.5 * math.log(2.0 * math.pi)
_LANE = 128  # TPU lane width; each head is padded to this many columns


def actor_kernel(s_ref, eps_ref,
                 w1_ref, b1_ref,
                 w2_ref, b2_ref,
                 wh_ref, bh_ref,
                 out_ref,
                 *, action_dim, max_action):
    # ---- base_fc: Linear -> ReLU -> Linear -> ReLU (bf16 MXU, f32 acc) ----
    h = jnp.dot(s_ref[...].astype(jnp.bfloat16), w1_ref[...],
                preferred_element_type=jnp.float32) + b1_ref[...]
    h = jnp.maximum(h, 0.0)
    h = jnp.dot(h.astype(jnp.bfloat16), w2_ref[...],
                preferred_element_type=jnp.float32) + b2_ref[...]
    h = jnp.maximum(h, 0.0)

    # ---- fused mean / log_std head: one [H, 2*128] matmul, 128-lane aligned ----
    head = jnp.dot(h.astype(jnp.bfloat16), wh_ref[...],
                   preferred_element_type=jnp.float32) + bh_ref[...]
    pad = eps_ref.shape[1]                       # = 128 (lane-padded head width)
    mean = head[:, :pad]                         # tile-aligned slice
    log_std = jnp.clip(head[:, pad:], LOG_SIG_MIN, LOG_SIG_MAX)
    std = jnp.exp(log_std)

    # ---- reparameterized TanhNormal sample (f32 epilogue) ----
    eps = eps_ref[...]                           # padded lanes are zero
    z = mean + std * eps
    a = jnp.tanh(z)

    # Normal(mean, std).log_prob(z) with (z - mean)/std == eps exactly,
    # minus the tanh change-of-variables correction.
    logp = (-0.5 * eps * eps - log_std - _HALF_LOG_2PI
            - jnp.log(1.0 - a * a + _EPS))

    # Mask out padded head columns (they yield nonzero logp otherwise).
    lane = lax.broadcasted_iota(jnp.int32, logp.shape, 1)
    valid = lane < action_dim
    logp_sum = jnp.sum(jnp.where(valid, logp, 0.0), axis=1, keepdims=True)

    # Lane-dense packed output: action in lanes [0, action_dim),
    # log_prob in lane `action_dim`.
    packed = jnp.where(valid, a * max_action, 0.0)
    packed = jnp.where(lane == action_dim, logp_sum, packed)
    out_ref[...] = packed.astype(out_ref.dtype)


def _round_up(x, m):
    return ((x + m - 1) // m) * m


def prepare_actor_params(params):
    """One-time parameter prep: fuse + lane-pad the two heads, cast to bf16.

    Run once per parameter update (NOT per forward call).
    """
    action_dim = params["wm"].shape[1]
    assert action_dim < _LANE, "action_dim must be < 128 for packed output"

    def padc(x):
        return jnp.pad(x, ((0, 0), (0, _LANE - x.shape[1])))

    wh = jnp.concatenate([padc(params["wm"]), padc(params["ws"])], axis=1)
    bh = jnp.concatenate([padc(params["bm"]), padc(params["bs"])], axis=1)
    return {
        "w1": params["w1"].astype(jnp.bfloat16),
        "b1": params["b1"].astype(jnp.float32),
        "w2": params["w2"].astype(jnp.bfloat16),
        "b2": params["b2"].astype(jnp.float32),
        "wh": wh.astype(jnp.bfloat16),             # [H, 2*128]
        "bh": bh.astype(jnp.float32),              # [1, 2*128]
        "action_dim": action_dim,
    }


def actor_forward(state, eps, prepared, max_action, *, tb=None):
    """Fused Actor forward pass (returns (action, log_prob)).

    state: [B, state_dim] f32
    eps:   [B, action_dim] f32 standard-normal noise (reparameterization)
    prepared: output of prepare_actor_params()
    """
    B, sd = state.shape
    ad = prepared["action_dim"]
    H = prepared["w1"].shape[1]

    # Lane-pad eps so the sample/log-prob math is lane-dense.
    eps_p = jnp.pad(eps.astype(jnp.float32), ((0, 0), (0, _LANE - ad)))

    # Batch tile: multiple of 8 sublanes, cap 1024 (amortizes ~0.35us/step),
    # and aim for >= 2 grid steps so v7x's two TensorCores both get work.
    if tb is None:
        want_steps = 2 if B >= 16 else 1
        tb = min(1024, _round_up(pl.cdiv(B, want_steps), 8))
    Bp = _round_up(B, tb)
    if Bp != B:
        pad_rows = Bp - B
        state = jnp.pad(state, ((0, pad_rows), (0, 0)))
        eps_p = jnp.pad(eps_p, ((0, pad_rows), (0, 0)))

    row = lambda i: (i, 0)     # batch-tiled operands/outputs
    rep = lambda i: (0, 0)     # weights/biases: resident across grid steps

    kernel = functools.partial(actor_kernel, action_dim=ad,
                               max_action=float(max_action))

    out = pl.pallas_call(
        kernel,
        grid=(Bp // tb,),
        in_specs=[
            pl.BlockSpec((tb, sd), row),            # state tile (f32)
            pl.BlockSpec((tb, _LANE), row),         # eps tile (lane-padded)
            pl.BlockSpec((sd, H), rep),             # w1 (bf16)
            pl.BlockSpec((1, H), rep),              # b1
            pl.BlockSpec((H, H), rep),              # w2 (bf16)
            pl.BlockSpec((1, H), rep),              # b2
            pl.BlockSpec((H, 2 * _LANE), rep),      # fused head weight (bf16)
            pl.BlockSpec((1, 2 * _LANE), rep),      # fused head bias
        ],
        out_specs=pl.BlockSpec((tb, _LANE), row),   # packed action|logp slab
        out_shape=jax.ShapeDtypeStruct((Bp, _LANE), jnp.float32),
        compiler_params=pltpu.CompilerParams(
            dimension_semantics=("parallel",)),
    )(state, eps_p, prepared["w1"], prepared["b1"],
      prepared["w2"], prepared["b2"], prepared["wh"], prepared["bh"])

    action = out[:B, :ad]
    log_prob = out[:B, ad:ad + 1]
    return action, log_prob


def init_actor_params(key, state_dim, action_dim, hidden_dim=256):
    """torch.nn.Linear-style init: U(-1/sqrt(fan_in), 1/sqrt(fan_in))."""
    keys = jax.random.split(key, 8)

    def lin(kw, kb, fan_in, fan_out):
        bound = 1.0 / math.sqrt(fan_in)
        w = jax.random.uniform(kw, (fan_in, fan_out), jnp.float32, -bound, bound)
        b = jax.random.uniform(kb, (1, fan_out), jnp.float32, -bound, bound)
        return w, b

    w1, b1 = lin(keys[0], keys[1], state_dim, hidden_dim)
    w2, b2 = lin(keys[2], keys[3], hidden_dim, hidden_dim)
    wm, bm = lin(keys[4], keys[5], hidden_dim, action_dim)
    ws, bs = lin(keys[6], keys[7], hidden_dim, action_dim)
    return {"w1": w1, "b1": b1, "w2": w2, "b2": b2,
            "wm": wm, "bm": bm, "ws": ws, "bs": bs}


def actor_reference(state, eps, params, max_action, matmul_dtype=jnp.float32):
    """Pure-JAX reference matching the torch forward().

    matmul_dtype=jnp.bfloat16 mimics the kernel's MXU precision path
    (bf16 inputs, f32 accumulation) for tight numeric comparison.
    """
    def mm(x, w):
        return jnp.dot(x.astype(matmul_dtype), w.astype(matmul_dtype),
                       preferred_element_type=jnp.float32)

    h = jnp.maximum(mm(state, params["w1"]) + params["b1"], 0.0)
    h = jnp.maximum(mm(h, params["w2"]) + params["b2"], 0.0)
    mean = mm(h, params["wm"]) + params["bm"]
    log_std = jnp.clip(mm(h, params["ws"]) + params["bs"],
                       LOG_SIG_MIN, LOG_SIG_MAX)
    std = jnp.exp(log_std)
    z = mean + std * eps
    a = jnp.tanh(z)
    logp = (-0.5 * ((z - mean) / std) ** 2 - log_std - _HALF_LOG_2PI
            - jnp.log(1.0 - a * a + _EPS))
    return a * max_action, jnp.sum(logp, axis=1, keepdims=True)


if __name__ == "__main__":
    key = jax.random.PRNGKey(0)
    k_params, k_state, k_eps = jax.random.split(key, 3)

    batch = 8
    state_dim = 12
    action_dim = 4
    hidden_dim = 256          # module default hidden_sizes=[256, 256]
    max_action = 2.0

    params = init_actor_params(k_params, state_dim, action_dim, hidden_dim)
    prepared = prepare_actor_params(params)   # hoisted out of per-call path

    state = jax.random.normal(k_state, (batch, state_dim), jnp.float32)
    eps = jax.random.normal(k_eps, (batch, action_dim), jnp.float32)

    action, log_prob = actor_forward(state, eps, prepared, max_action)
    action = jax.block_until_ready(action)
    log_prob = jax.block_until_ready(log_prob)

    assert action.shape == (batch, action_dim), action.shape
    assert log_prob.shape == (batch, 1), log_prob.shape

    # Tight check vs a reference that matches the kernel's bf16 MXU path.
    a_bf, lp_bf = actor_reference(state, eps, params, max_action,
                                  matmul_dtype=jnp.bfloat16)
    assert jnp.allclose(action, a_bf, atol=5e-3, rtol=5e-3), (action, a_bf)
    assert jnp.allclose(log_prob, lp_bf, atol=5e-3, rtol=5e-3), (log_prob, lp_bf)

    # Looser sanity check vs the full-f32 reference.
    a_f32, lp_f32 = actor_reference(state, eps, params, max_action)
    assert jnp.allclose(action, a_f32, atol=1e-1, rtol=1e-1), (action, a_f32)
    assert jnp.allclose(log_prob, lp_f32, atol=1e-1, rtol=1e-1), (log_prob, lp_f32)

    print("KERNEL_OK")
</pallas_src>

<mosaic_0001>
module attributes {stable_mosaic.version = 11 : i64} {
  func.func @actor_kernel(%arg0: i32, %arg1: memref<8x12xf32, #tpu.memory_space<vmem>>, %arg2: memref<8x128xf32, #tpu.memory_space<vmem>>, %arg3: memref<12x256xbf16, #tpu.memory_space<vmem>>, %arg4: memref<1x256xf32, #tpu.memory_space<vmem>>, %arg5: memref<256x256xbf16, #tpu.memory_space<vmem>>, %arg6: memref<1x256xf32, #tpu.memory_space<vmem>>, %arg7: memref<256x256xbf16, #tpu.memory_space<vmem>>, %arg8: memref<1x256xf32, #tpu.memory_space<vmem>>, %arg9: memref<8x128xf32, #tpu.memory_space<vmem>>) attributes {dimension_semantics = [#tpu.dimension_semantics<parallel>], iteration_bounds = array<i64: 1>, scalar_prefetch = 0 : i64, scratch_operands = 0 : i64, tpu.core_type = #tpu.core_type<tc>, window_params = [{transform_indices = @transform_0, window_bounds = array<i64: 8, 12>}, {transform_indices = @transform_1, window_bounds = array<i64: 8, 128>}, {pipeline_mode = #tpu.pipeline_mode<synchronous>, transform_indices = @transform_2, window_bounds = array<i64: 12, 256>}, {pipeline_mode = #tpu.pipeline_mode<synchronous>, transform_indices = @transform_3, window_bounds = array<i64: 1, 256>}, {pipeline_mode = #tpu.pipeline_mode<synchronous>, transform_indices = @transform_4, window_bounds = array<i64: 256, 256>}, {pipeline_mode = #tpu.pipeline_mode<synchronous>, transform_indices = @transform_5, window_bounds = array<i64: 1, 256>}, {pipeline_mode = #tpu.pipeline_mode<synchronous>, transform_indices = @transform_6, window_bounds = array<i64: 256, 256>}, {pipeline_mode = #tpu.pipeline_mode<synchronous>, transform_indices = @transform_7, window_bounds = array<i64: 1, 256>}, {transform_indices = @transform_8, window_bounds = array<i64: 8, 128>}]} {
    %c0 = arith.constant 0 : index
    %c0_0 = arith.constant 0 : index
    %0 = vector.load %arg1[%c0, %c0_0] : memref<8x12xf32, #tpu.memory_space<vmem>>, vector<8x12xf32>
    %1 = arith.truncf %0 : vector<8x12xf32> to vector<8x12xbf16>
    %c0_1 = arith.constant 0 : index
    %c0_2 = arith.constant 0 : index
    %2 = vector.load %arg3[%c0_1, %c0_2] : memref<12x256xbf16, #tpu.memory_space<vmem>>, vector<12x256xbf16>
    %cst = arith.constant dense<0.000000e+00> : vector<8x256xf32>
    %3 = tpu.matmul %1, %2, %cst {dimension_numbers = #tpu.dot_dimension_numbers<[1], [0], [0], [1], [0, 0, 1, 1], [], []>} : vector<8x12xbf16>, vector<12x256xbf16>, vector<8x256xf32> -> vector<8x256xf32>
    %c0_3 = arith.constant 0 : index
    %c0_4 = arith.constant 0 : index
    %4 = vector.load %arg4[%c0_3, %c0_4] : memref<1x256xf32, #tpu.memory_space<vmem>>, vector<1x256xf32>
    %5 = vector.broadcast %4 : vector<1x256xf32> to vector<8x256xf32>
    %6 = arith.addf %3, %5 : vector<8x256xf32>
    %cst_5 = arith.constant 0.000000e+00 : f32
    %7 = vector.broadcast %cst_5 : f32 to vector<8x256xf32>
    %8 = arith.maximumf %6, %7 : vector<8x256xf32>
    %9 = arith.truncf %8 : vector<8x256xf32> to vector<8x256xbf16>
    %c0_6 = arith.constant 0 : index
    %c0_7 = arith.constant 0 : index
    %10 = vector.load %arg5[%c0_6, %c0_7] : memref<256x256xbf16, #tpu.memory_space<vmem>>, vector<256x256xbf16>
    %cst_8 = arith.constant dense<0.000000e+00> : vector<8x256xf32>
    %11 = tpu.matmul %9, %10, %cst_8 {dimension_numbers = #tpu.dot_dimension_numbers<[1], [0], [0], [1], [0, 0, 1, 1], [], []>} : vector<8x256xbf16>, vector<256x256xbf16>, vector<8x256xf32> -> vector<8x256xf32>
    %c0_9 = arith.constant 0 : index
    %c0_10 = arith.constant 0 : index
    %12 = vector.load %arg6[%c0_9, %c0_10] : memref<1x256xf32, #tpu.memory_space<vmem>>, vector<1x256xf32>
    %13 = vector.broadcast %12 : vector<1x256xf32> to vector<8x256xf32>
    %14 = arith.addf %11, %13 : vector<8x256xf32>
    %cst_11 = arith.constant 0.000000e+00 : f32
    %15 = vector.broadcast %cst_11 : f32 to vector<8x256xf32>
    %16 = arith.maximumf %14, %15 : vector<8x256xf32>
    %17 = arith.truncf %16 : vector<8x256xf32> to vector<8x256xbf16>
    %c0_12 = arith.constant 0 : index
    %c0_13 = arith.constant 0 : index
    %18 = vector.load %arg7[%c0_12, %c0_13] : memref<256x256xbf16, #tpu.memory_space<vmem>>, vector<256x256xbf16>
    %cst_14 = arith.constant dense<0.000000e+00> : vector<8x256xf32>
    %19 = tpu.matmul %17, %18, %cst_14 {dimension_numbers = #tpu.dot_dimension_numbers<[1], [0], [0], [1], [0, 0, 1, 1], [], []>} : vector<8x256xbf16>, vector<256x256xbf16>, vector<8x256xf32> -> vector<8x256xf32>
    %c0_15 = arith.constant 0 : index
    %c0_16 = arith.constant 0 : index
    %20 = vector.load %arg8[%c0_15, %c0_16] : memref<1x256xf32, #tpu.memory_space<vmem>>, vector<1x256xf32>
    %21 = vector.broadcast %20 : vector<1x256xf32> to vector<8x256xf32>
    %22 = arith.addf %19, %21 : vector<8x256xf32>
    %23 = vector.extract_strided_slice %22 {offsets = [0, 0], sizes = [8, 128], strides = [1, 1]} : vector<8x256xf32> to vector<8x128xf32>
    %24 = vector.extract_strided_slice %22 {offsets = [0, 128], sizes = [8, 128], strides = [1, 1]} : vector<8x256xf32> to vector<8x128xf32>
    %cst_17 = arith.constant -2.000000e+01 : f32
    %cst_18 = arith.constant 2.000000e+00 : f32
    %25 = vector.broadcast %cst_17 : f32 to vector<8x128xf32>
    %26 = arith.maximumf %25, %24 : vector<8x128xf32>
    %27 = vector.broadcast %cst_18 : f32 to vector<8x128xf32>
    %28 = arith.minimumf %27, %26 : vector<8x128xf32>
    %29 = math.exp %28 : vector<8x128xf32>
    %c0_19 = arith.constant 0 : index
    %c0_20 = arith.constant 0 : index
    %30 = vector.load %arg2[%c0_19, %c0_20] : memref<8x128xf32, #tpu.memory_space<vmem>>, vector<8x128xf32>
    %31 = arith.mulf %29, %30 : vector<8x128xf32>
    %32 = arith.addf %23, %31 : vector<8x128xf32>
    %33 = math.tanh %32 : vector<8x128xf32>
    %cst_21 = arith.constant -5.000000e-01 : f32
    %34 = vector.broadcast %cst_21 : f32 to vector<8x128xf32>
    %35 = arith.mulf %34, %30 : vector<8x128xf32>
    %36 = arith.mulf %35, %30 : vector<8x128xf32>
    %37 = arith.subf %36, %28 : vector<8x128xf32>
    %cst_22 = arith.constant 0.918938517 : f32
    %38 = vector.broadcast %cst_22 : f32 to vector<8x128xf32>
    %39 = arith.subf %37, %38 : vector<8x128xf32>
    %40 = arith.mulf %33, %33 : vector<8x128xf32>
    %cst_23 = arith.constant 1.000000e+00 : f32
    %41 = vector.broadcast %cst_23 : f32 to vector<8x128xf32>
    %42 = arith.subf %41, %40 : vector<8x128xf32>
    %cst_24 = arith.constant 9.99999997E-7 : f32
    %43 = vector.broadcast %cst_24 : f32 to vector<8x128xf32>
    %44 = arith.addf %42, %43 : vector<8x128xf32>
    %45 = math.log %44 : vector<8x128xf32>
    %46 = arith.subf %39, %45 : vector<8x128xf32>
    %47 = tpu.iota {dimensions = array<i32: 1>} : vector<8x128xi32>
    %c4_i32 = arith.constant 4 : i32
    %48 = vector.broadcast %c4_i32 : i32 to vector<8x128xi32>
    %49 = arith.cmpi slt, %47, %48 : vector<8x128xi32>
    %cst_25 = arith.constant 0.000000e+00 : f32
    %50 = vector.broadcast %cst_25 : f32 to vector<8x128xf32>
    %51 = arith.select %49, %46, %50 : vector<8x128xi1>, vector<8x128xf32>
    %cst_26 = arith.constant dense<0.000000e+00> : vector<8xf32>
    %52 = vector.multi_reduction <add>, %51, %cst_26 [1] : vector<8x128xf32> to vector<8xf32>
    %53 = vector.shape_cast %52 : vector<8xf32> to vector<8x1xf32>
    %cst_27 = arith.constant 2.000000e+00 : f32
    %54 = vector.broadcast %cst_27 : f32 to vector<8x128xf32>
    %55 = arith.mulf %33, %54 : vector<8x128xf32>
    %cst_28 = arith.constant 0.000000e+00 : f32
    %56 = vector.broadcast %cst_28 : f32 to vector<8x128xf32>
    %57 = arith.select %49, %55, %56 : vector<8x128xi1>, vector<8x128xf32>
    %c4_i32_29 = arith.constant 4 : i32
    %58 = vector.broadcast %c4_i32_29 : i32 to vector<8x128xi32>
    %59 = arith.cmpi eq, %47, %58 : vector<8x128xi32>
    %60 = vector.shape_cast %53 : vector<8x1xf32> to vector<8x1xf32>
    %61 = vector.broadcast %60 : vector<8x1xf32> to vector<8x128xf32>
    %62 = arith.select %59, %61, %57 : vector<8x128xi1>, vector<8x128xf32>
    %c0_30 = arith.constant 0 : index
    %c0_31 = arith.constant 0 : index
    %63 = vector.load %arg9[%c0_30, %c0_31] : memref<8x128xf32, #tpu.memory_space<vmem>>, vector<8x128xf32>
    tpu.vector_store %arg9[%c0_30, %c0_31], %62 {strides = array<i32>} : memref<8x128xf32, #tpu.memory_space<vmem>>, vector<8x128xf32>,
    return
  }
  func.func @transform_0(%arg0: i32) -> (i32, i32) {
    %c0_i32 = arith.constant 0 : i32
    %c0_i32_0 = arith.constant 0 : i32
    return %arg0, %c0_i32 : i32, i32
  }
  func.func @transform_1(%arg0: i32) -> (i32, i32) {
    %c0_i32 = arith.constant 0 : i32
    %c0_i32_0 = arith.constant 0 : i32
    return %arg0, %c0_i32 : i32, i32
  }
  func.func @transform_2(%arg0: i32) -> (i32, i32) {
    %c0_i32 = arith.constant 0 : i32
    %c0_i32_0 = arith.constant 0 : i32
    %c0_i32_1 = arith.constant 0 : i32
    return %c0_i32, %c0_i32_0 : i32, i32
  }
  func.func @transform_3(%arg0: i32) -> (i32, i32) {
    %c0_i32 = arith.constant 0 : i32
    %c0_i32_0 = arith.constant 0 : i32
    %c0_i32_1 = arith.constant 0 : i32
    return %c0_i32, %c0_i32_0 : i32, i32
  }
  func.func @transform_4(%arg0: i32) -> (i32, i32) {
    %c0_i32 = arith.constant 0 : i32
    %c0_i32_0 = arith.constant 0 : i32
    %c0_i32_1 = arith.constant 0 : i32
    return %c0_i32, %c0_i32_0 : i32, i32
  }
  func.func @transform_5(%arg0: i32) -> (i32, i32) {
    %c0_i32 = arith.constant 0 : i32
    %c0_i32_0 = arith.constant 0 : i32
    %c0_i32_1 = arith.constant 0 : i32
    return %c0_i32, %c0_i32_0 : i32, i32
  }
  func.func @transform_6(%arg0: i32) -> (i32, i32) {
    %c0_i32 = arith.constant 0 : i32
    %c0_i32_0 = arith.constant 0 : i32
    %c0_i32_1 = arith.constant 0 : i32
    return %c0_i32, %c0_i32_0 : i32, i32
  }
  func.func @transform_7(%arg0: i32) -> (i32, i32) {
    %c0_i32 = arith.constant 0 : i32
    %c0_i32_0 = arith.constant 0 : i32
    %c0_i32_1 = arith.constant 0 : i32
    return %c0_i32, %c0_i32_0 : i32, i32
  }
  func.func @transform_8(%arg0: i32) -> (i32, i32) {
    %c0_i32 = arith.constant 0 : i32
    %c0_i32_0 = arith.constant 0 : i32
    return %arg0, %c0_i32 : i32, i32
  }
}

</mosaic_0001>

<bundles_post_ra>
// kernel: tpu_custom_call.1
= control target key start
LH: loop header
LB: loop body
LE: loop exit
PB: predicated region body
PF: predicated region fallthrough
CT: control target
= control target key end

     0   :  { %13 = vsyncpa [#allocation3], 0  ;;  %s1182_s0 = inlined_call_operand.hbm [shape: f32[8,12], index: 0, kind: input, shape index: {}]   ;;  %s1183_s1 = inlined_call_operand.hbm [shape: f32[8,128], index: 1, kind: input, shape index: {}]   ;;  %s1184_s2 = inlined_call_operand.hbm [shape: bf16[12,256], index: 2, kind: input, shape index: {}]   ;;  %s1185_s3 = inlined_call_operand.vmem [shape: f32[1,256], index: 3, kind: input, shape index: {}]   ;;  %s1186_s4 = inlined_call_operand.hbm [shape: bf16[256,256], index: 4, kind: input, shape index: {}]   ;;  %s1187_s5 = inlined_call_operand.vmem [shape: f32[1,256], index: 5, kind: input, shape index: {}]   ;;  %s1188_s6 = inlined_call_operand.hbm [shape: bf16[256,256], index: 6, kind: input, shape index: {}]   ;;  %s1189_s7 = inlined_call_operand.vmem [shape: f32[1,256], index: 7, kind: input, shape index: {}]   ;;  %s1190_s8 = inlined_call_operand.hbm [shape: f32[8,128], index: 8, kind: output, shape index: {}]  }
   0x1   :  { %14 = vsyncpa [#allocation6], 0 }
   0x2   :  { %15 = vsyncpa [#allocation9], 0 }
   0x3   :  { %16 = vsyncpa [#allocation4], 0  ;;  %s1038_s27 = smov [#allocation5]   ;;  %s898_s9 = scalar_lea.hbm %s1183_s1, 128 }
   0x4   :  { %s33_s28 = sshll.u32 %s1038_s27, 4  ;;  %p899_p0 = scmp.ne.s32.totalorder %s1183_s1, %s898_s9  ;;  %s34_s28 = int_to_ptr.vmem [resolvable:$true] %s33_s28 }
   0x5   :  { %p902_p1 = scmp.lt.u32.totalorder %s898_s9, %s1183_s1 }
   0x7   :  { %p904_p2 = pnand %p902_p1, %p899_p0 }
   0x9   :  { %907 = shalt.err (!%p904_p2)
}
   0xa   :  { %s908_s14 = scalar_lea.vmem %s34_s28, 128  ;;  %p913_p4 = scmp.lt.s32.totalorder %s34_s28, %s34_s28 }
   0xb   :  { %p909_p3 = scmp.ne.s32.totalorder %s34_s28, %s908_s14  ;;  %p914_p5 = scmp.lt.s32.totalorder %s908_s14, %s908_s14 }
   0xd   :  { %p915_p6 = por %p914_p5, %p913_p4 }
   0xf   :  { %p916_p7 = pnand %p915_p6, %p909_p3 }
  0x11   :  { %919 = shalt.err (!%p916_p7)
}
  0x12   :  { %36 = dma.hbm_to_vmem [thread:$0]  %s1183_s1, 128, %s34_s28, [#allocation6]  }
  0x13   :  { %s1039_s17 = smov [#allocation8]   ;;  %s1040_s19 = smov [#allocation2]  }
  0x14   :  { %s56_s18 = sshll.u32 %s1039_s17, 4  ;;  %s23_s20 = sshll.u32 %s1040_s19, 4  ;;  %s57_s18 = int_to_ptr.vmem [resolvable:$true] %s56_s18  ;;  %s24_s20 = int_to_ptr.vmem [resolvable:$true] %s23_s20 }
  0x15   :  { %s920_s23 = scalar_lea.hbm %s1186_s4, 4096 }
  0x16   :  { %p921_p8 = scmp.ne.s32.totalorder %s1186_s4, %s920_s23  ;;  %p924_p9 = scmp.lt.u32.totalorder %s920_s23, %s1186_s4 }
  0x18   :  { %p926_p10 = pnand %p924_p9, %p921_p8 }
  0x1a   :  { %929 = shalt.err (!%p926_p10)
}
  0x1b   :  { %s930_s1 = scalar_lea.vmem %s57_s18, 4096  ;;  %p935_p12 = scmp.lt.s32.totalorder %s57_s18, %s57_s18 }
  0x1c   :  { %p931_p11 = scmp.ne.s32.totalorder %s57_s18, %s930_s1  ;;  %p936_p13 = scmp.lt.s32.totalorder %s930_s1, %s930_s1 }
  0x1e   :  { %p937_p0 = por %p936_p13, %p935_p12 }
  0x20   :  { %p938_p1 = pnand %p937_p0, %p931_p11 }
  0x22   :  { %941 = shalt.err (!%p938_p1)
}
  0x23   :  { %s1041_s28 = smov 128   ;;  %s1042_s29 = smov 8  }
  0x24   :  { %62 = dma.hbm_to_vmem [thread:$0]  %s1186_s4, 4096, %s57_s18, [#allocation9], %s1041_s28, %s1041_s28, %s1042_s29  }
  0x25   :  { %s942_s12 = scalar_lea.hbm %s1182_s0, 128 }
  0x26   :  { %p943_p2 = scmp.ne.s32.totalorder %s1182_s0, %s942_s12  ;;  %p946_p3 = scmp.lt.u32.totalorder %s942_s12, %s1182_s0 }
  0x28   :  { %p948_p4 = pnand %p946_p3, %p943_p2 }
  0x2a   :  { %951 = shalt.err (!%p948_p4)
}
  0x2b   :  { %s952_s17 = scalar_lea.vmem %s24_s20, 128  ;;  %p957_p6 = scmp.lt.s32.totalorder %s24_s20, %s24_s20 }
  0x2c   :  { %p953_p5 = scmp.ne.s32.totalorder %s24_s20, %s952_s17  ;;  %p958_p7 = scmp.lt.s32.totalorder %s952_s17, %s952_s17 }
  0x2e   :  { %p959_p8 = por %p958_p7, %p957_p6 }
  0x30   :  { %p960_p9 = pnand %p959_p8, %p953_p5 }
  0x32   :  { %963 = shalt.err (!%p960_p9)
}
  0x33   :  { %26 = dma.hbm_to_vmem [thread:$0]  %s1182_s0, 128, %s24_s20, [#allocation3]  }
  0x34   :  { %s1043_s19 = smov [#allocation7]   ;;  %s1044_s22 = smov [#allocation10]  }
  0x35   :  { %s42_s21 = sshll.u32 %s1043_s19, 4  ;;  %s70_s23 = sshll.u32 %s1044_s22, 4  ;;  %s43_s21 = int_to_ptr.vmem [resolvable:$true] %s42_s21  ;;  %s71_s23 = int_to_ptr.vmem [resolvable:$true] %s70_s23 }
  0x36   :  { %s964_s26 = scalar_lea.hbm %s1184_s2, 256 }
  0x37   :  { %p965_p10 = scmp.ne.s32.totalorder %s1184_s2, %s964_s26  ;;  %p968_p11 = scmp.lt.u32.totalorder %s964_s26, %s1184_s2 }
  0x39   :  { %p970_p12 = pnand %p968_p11, %p965_p10 }
  0x3b   :  { %973 = shalt.err (!%p970_p12)
}
  0x3c   :  { %s974_s0 = scalar_lea.vmem %s43_s21, 256  ;;  %p979_p0 = scmp.lt.s32.totalorder %s43_s21, %s43_s21 }
  0x3d   :  { %p975_p13 = scmp.ne.s32.totalorder %s43_s21, %s974_s0  ;;  %p980_p1 = scmp.lt.s32.totalorder %s974_s0, %s974_s0 }
  0x3f   :  { %p981_p2 = por %p980_p1, %p979_p0 }
  0x41   :  { %p982_p3 = pnand %p981_p2, %p975_p13 }
  0x43   :  { %985 = shalt.err (!%p982_p3)
}
  0x44   :  { %48 = dma.hbm_to_vmem [thread:$0]  %s1184_s2, 256, %s43_s21, [#allocation6], %s1041_s28, %s1041_s28, %s1042_s29  }
  0x45   :  { %s986_s13 = scalar_lea.hbm %s1188_s6, 4096 }
  0x46   :  { %p987_p4 = scmp.ne.s32.totalorder %s1188_s6, %s986_s13  ;;  %p990_p5 = scmp.lt.u32.totalorder %s986_s13, %s1188_s6 }
  0x48   :  { %p992_p6 = pnand %p990_p5, %p987_p4 }
  0x4a   :  { %995 = shalt.err (!%p992_p6)
}
  0x4b   :  { %s996_s4 = scalar_lea.vmem %s71_s23, 4096  ;;  %p1001_p8 = scmp.lt.s32.totalorder %s71_s23, %s71_s23 }
  0x4c   :  { %p997_p7 = scmp.ne.s32.totalorder %s71_s23, %s996_s4  ;;  %p1002_p9 = scmp.lt.s32.totalorder %s996_s4, %s996_s4 }
  0x4e   :  { %p1003_p10 = por %p1002_p9, %p1001_p8 }
  0x50   :  { %p1004_p11 = pnand %p1003_p10, %p997_p7 }
  0x52   :  { %1007 = shalt.err (!%p1004_p11)
}
  0x53   :  { %76 = dma.hbm_to_vmem [thread:$0]  %s1188_s6, 4096, %s71_s23, [#allocation9], %s1041_s28, %s1041_s28, %s1042_s29  }
  0x54   :  { %1030 = dma.done.wait [#allocation3], 128  }
  0x55   :  { %1031 = vsyncadd [#allocation3], 4294967168 }
  0x56   :  { %1032 = dma.done.wait [#allocation6], 384  }
  0x57   :  { %1033 = vsyncadd [#allocation6], 4294966912 }
  0x58   :  { %1034 = dma.done.wait [#allocation9], 8192  }
  0x59   :  { %1035 = vsyncadd [#allocation9], 4294959104  ;;  %v1045_v0 = vmov 0   ;;  %vm123_vm0 = vcmask 1045504   ;;  %v95_v3 = vld [vmem:[#allocation2] sm:$0xff]  ;;  %vm119_vm1 = vcmask 97280  }
  0x5a   :  { %162 = vmatprep.mubr.bf16.mxu0 %v1045_v0  ;;  %v793_v1 = vld [vmem:[#allocation7 + $0x4] ss:$8 sps:$4 sm:$0x3f]   ;;  %v795_v2 = vld [vmem:[#allocation7] ss:$8 sps:$4 sm:$0x3f]   ;;  %v96_v7 = vpack.c.bf16 %v95_v3, %v95_v3 }
  0x5b   :  { %717 = vmatprep.subr.msk.bf16.mxu0 %vm123_vm0, %v793_v1  ;;  %v796_v4 = vld [vmem:[#allocation8 + $0x4] ss:$8 sps:$4 sm:$0xff]   ;;  %v798_v5 = vld [vmem:[#allocation8] ss:$8 sps:$4 sm:$0xff]   ;;  %v125_v6 = vsel %vm123_vm0, %v795_v2, 0  ;;  %v101_v2 = vlaneseq }
  0x5c   :  { %v799_v8 = vld [vmem:[#allocation8 + $0x14] ss:$8 sps:$4 sm:$0xff]   ;;  %131 = vmatpush1.bf16.msra.mxu0 %v125_v6  ;;  %379 = vmatprep.subr.bf16.mxu1 %v796_v4  ;;  %v801_v9 = vld [vmem:[#allocation8 + $0x10] ss:$8 sps:$4 sm:$0xff]   ;;  %v802_v10 = vld [vmem:[#allocation8 + $0x24] ss:$8 sps:$4 sm:$0xff]  }
  0x5d   :  { %380 = vmatpush1.bf16.msra.mxu1 %v798_v5  ;;  %v804_v11 = vld [vmem:[#allocation8 + $0x20] ss:$8 sps:$4 sm:$0xff]   ;;  %v805_v12 = vld [vmem:[#allocation8 + $0x34] ss:$8 sps:$4 sm:$0xff]   ;;  %v807_v13 = vld [vmem:[#allocation8 + $0x30] ss:$8 sps:$4 sm:$0xff]  }
  0x5e   :  { %381 = vmatprep.subr.bf16.mxu1 %v799_v8  ;;  %v808_v14 = vld [vmem:[#allocation8 + $0x44] ss:$8 sps:$4 sm:$0xff]   ;;  %v810_v15 = vld [vmem:[#allocation8 + $0x40] ss:$8 sps:$4 sm:$0xff]   ;;  %v811_v16 = vld [vmem:[#allocation8 + $0x54] ss:$8 sps:$4 sm:$0xff]  }
  0x5f   :  { %718 = vmatmul.mubr.msk.bf16.vlgmr.msra.gmra.mrb[0].mxu0 %vm119_vm1, %v96_v7  ;;  %v813_v17 = vld [vmem:[#allocation8 + $0x50] ss:$8 sps:$4 sm:$0xff]   ;;  %v814_v18 = vld [vmem:[#allocation8 + $0x64] ss:$8 sps:$4 sm:$0xff]   ;;  %v816_v19 = vld [vmem:[#allocation8 + $0x60] ss:$8 sps:$4 sm:$0xff]  }
  0x60   :  { %v817_v20 = vld [vmem:[#allocation8 + $0x74] ss:$8 sps:$4 sm:$0xff]   ;;  %v819_v21 = vld [vmem:[#allocation8 + $0x70] ss:$8 sps:$4 sm:$0xff]   ;;  %v820_v22 = vld [vmem:[#allocation8 + $0x84] ss:$8 sps:$4 sm:$0xff]  }
  0x61   :  { %382 = vmatpush1.bf16.msra.mxu1 %v801_v9  ;;  %v822_v23 = vld [vmem:[#allocation8 + $0x80] ss:$8 sps:$4 sm:$0xff]   ;;  %v823_v24 = vld [vmem:[#allocation8 + $0x94] ss:$8 sps:$4 sm:$0xff]   ;;  %v825_v25 = vld [vmem:[#allocation8 + $0x90] ss:$8 sps:$4 sm:$0xff]  }
  0x62   :  { %383 = vmatprep.subr.bf16.mxu1 %v802_v10  ;;  %v826_v26 = vld [vmem:[#allocation8 + $0xa4] ss:$8 sps:$4 sm:$0xff]   ;;  %v828_v27 = vld [vmem:[#allocation8 + $0xa0] ss:$8 sps:$4 sm:$0xff]   ;;  %v829_v28 = vld [vmem:[#allocation8 + $0xb4] ss:$8 sps:$4 sm:$0xff]  }
  0x63   :  { %v831_v29 = vld [vmem:[#allocation8 + $0xb0] ss:$8 sps:$4 sm:$0xff]   ;;  %v832_v30 = vld [vmem:[#allocation8 + $0xc4] ss:$8 sps:$4 sm:$0xff]   ;;  %v834_v31 = vld [vmem:[#allocation8 + $0xc0] ss:$8 sps:$4 sm:$0xff]  }
  0x64   :  { %v835_v32 = vld [vmem:[#allocation8 + $0xd4] ss:$8 sps:$4 sm:$0xff]   ;;  %v837_v33 = vld [vmem:[#allocation8 + $0xd0] ss:$8 sps:$4 sm:$0xff]   ;;  %v838_v34 = vld [vmem:[#allocation8 + $0xe4] ss:$8 sps:$4 sm:$0xff]  }
  0x65   :  { %384 = vmatpush1.bf16.msra.mxu1 %v804_v11  ;;  %v840_v35 = vld [vmem:[#allocation8 + $0xe0] ss:$8 sps:$4 sm:$0xff]   ;;  %v841_v36 = vld [vmem:[#allocation8 + $0xf4] ss:$8 sps:$4 sm:$0xff]   ;;  %v843_v37 = vld [vmem:[#allocation8 + $0xf0] ss:$8 sps:$4 sm:$0xff]  }
  0x66   :  { %385 = vmatprep.subr.bf16.mxu1 %v805_v12  ;;  %v844_v38 = vld [vmem:[#allocation10] ss:$8 sps:$4 sm:$0xff]   ;;  %v846_v39 = vld [vmem:[#allocation10 + $0x4] ss:$8 sps:$4 sm:$0xff]   ;;  %v849_v40 = vld [vmem:[#allocation10 + $0x14] ss:$8 sps:$4 sm:$0xff]  }
  0x67   :  { %628 = vmatprep.subr.bf16.mxu0 %v846_v39  ;;  %v847_v41 = vld [vmem:[#allocation10 + $0x10] ss:$8 sps:$4 sm:$0xff]   ;;  %v852_v42 = vld [vmem:[#allocation10 + $0x24] ss:$8 sps:$4 sm:$0xff]   ;;  %v850_v43 = vld [vmem:[#allocation10 + $0x20] ss:$8 sps:$4 sm:$0xff]  }
  0x68   :  { %629 = vmatpush1.bf16.msra.mxu0 %v844_v38  ;;  %v855_v44 = vld [vmem:[#allocation10 + $0x34] ss:$8 sps:$4 sm:$0xff]   ;;  %v853_v45 = vld [vmem:[#allocation10 + $0x30] ss:$8 sps:$4 sm:$0xff]   ;;  %v858_v46 = vld [vmem:[#allocation10 + $0x44] ss:$8 sps:$4 sm:$0xff]  }
  0x69   :  { %386 = vmatpush1.bf16.msra.mxu1 %v807_v13  ;;  %630 = vmatprep.subr.bf16.mxu0 %v849_v40  ;;  %v856_v47 = vld [vmem:[#allocation10 + $0x40] ss:$8 sps:$4 sm:$0xff]   ;;  %v861_v48 = vld [vmem:[#allocation10 + $0x54] ss:$8 sps:$4 sm:$0xff]   ;;  %v859_v49 = vld [vmem:[#allocation10 + $0x50] ss:$8 sps:$4 sm:$0xff]  }
  0x6a   :  { %387 = vmatprep.subr.bf16.mxu1 %v808_v14  ;;  %v864_v50 = vld [vmem:[#allocation10 + $0x64] ss:$8 sps:$4 sm:$0xff]   ;;  %v862_v51 = vld [vmem:[#allocation10 + $0x60] ss:$8 sps:$4 sm:$0xff]   ;;  %v867_v52 = vld [vmem:[#allocation10 + $0x74] ss:$8 sps:$4 sm:$0xff]  }
  0x6b   :  { %v865_v53 = vld [vmem:[#allocation10 + $0x70] ss:$8 sps:$4 sm:$0xff]   ;;  %v870_v54 = vld [vmem:[#allocation10 + $0x84] ss:$8 sps:$4 sm:$0xff]   ;;  %v868_v55 = vld [vmem:[#allocation10 + $0x80] ss:$8 sps:$4 sm:$0xff]  }
  0x6c   :  { %631 = vmatpush1.bf16.msra.mxu0 %v847_v41  ;;  %v873_v56 = vld [vmem:[#allocation10 + $0x94] ss:$8 sps:$4 sm:$0xff]   ;;  %v871_v57 = vld [vmem:[#allocation10 + $0x90] ss:$8 sps:$4 sm:$0xff]   ;;  %v876_v58 = vld [vmem:[#allocation10 + $0xa4] ss:$8 sps:$4 sm:$0xff]  }
  0x6d   :  { %388 = vmatpush1.bf16.msra.mxu1 %v810_v15  ;;  %632 = vmatprep.subr.bf16.mxu0 %v852_v42  ;;  %v874_v59 = vld [vmem:[#allocation10 + $0xa0] ss:$8 sps:$4 sm:$0xff]   ;;  %v879_v60 = vld [vmem:[#allocation10 + $0xb4] ss:$8 sps:$4 sm:$0xff]   ;;  %v877_v61 = vld [vmem:[#allocation10 + $0xb0] ss:$8 sps:$4 sm:$0xff]  }
  0x6e   :  { %389 = vmatprep.subr.bf16.mxu1 %v811_v16  ;;  %v882_v62 = vld [vmem:[#allocation10 + $0xc4] ss:$8 sps:$4 sm:$0xff]   ;;  %v880_v63 = vld [vmem:[#allocation10 + $0xc0] ss:$8 sps:$4 sm:$0xff]   ;;  %v885_v0 = vld [vmem:[#allocation10 + $0xd4] ss:$8 sps:$4 sm:$0xff]  }
  0x6f   :  { %v883_v1 = vld [vmem:[#allocation10 + $0xd0] ss:$8 sps:$4 sm:$0xff]   ;;  %v102_v3 = vshrl.u32 %v101_v2, 7  ;;  %v99_v5 = vld [vmem:[%s1185_s3] sm:$0x3] }
  0x70   :  { %633 = vmatpush1.bf16.msra.mxu0 %v850_v43 }
  0x71   :  { %390 = vmatpush1.bf16.msra.mxu1 %v813_v17  ;;  %634 = vmatprep.subr.bf16.mxu0 %v855_v44  ;;  %v103_v4 = vsub.s32 0, %v102_v3  ;;  %v107_v6 = vsub.s32 1, %v102_v3 }
  0x72   :  { %391 = vmatprep.subr.bf16.mxu1 %v814_v18 }
  0x73   :  { %v104_v7 = vrot.slane %v99_v5, %v103_v4  ;;  %v108_v8 = vrot.slane %v99_v5, %v107_v6 }
  0x74   :  { %635 = vmatpush1.bf16.msra.mxu0 %v853_v45 }
  0x75   :  { %392 = vmatpush1.bf16.msra.mxu1 %v816_v19  ;;  %636 = vmatprep.subr.bf16.mxu0 %v858_v46  ;;  %v888_v19 = vld [vmem:[#allocation10 + $0xe4] ss:$8 sps:$4 sm:$0xff]  }
  0x76   :  { %393 = vmatprep.subr.bf16.mxu1 %v817_v20  ;;  %v886_v20 = vld [vmem:[#allocation10 + $0xe0] ss:$8 sps:$4 sm:$0xff]  }
  0x78   :  { %637 = vmatpush1.bf16.msra.mxu0 %v856_v47 }
  0x79   :  { %394 = vmatpush1.bf16.msra.mxu1 %v819_v21  ;;  %638 = vmatprep.subr.bf16.mxu0 %v861_v48  ;;  %v891_v21 = vld [vmem:[#allocation10 + $0xf4] ss:$8 sps:$4 sm:$0xff]   ;;  %v673_v48 = vld [vmem:[#allocation5] sm:$0xff] }
  0x7a   :  { %395 = vmatprep.subr.bf16.mxu1 %v820_v22  ;;  %v889_v22 = vld [vmem:[#allocation10 + $0xf0] ss:$8 sps:$4 sm:$0xff]  }
  0x7c   :  { %639 = vmatpush1.bf16.msra.mxu0 %v859_v49 }
  0x7d   :  { %396 = vmatpush1.bf16.msra.mxu1 %v822_v23  ;;  %640 = vmatprep.subr.bf16.mxu0 %v864_v50  ;;  %v207_v23 = vld [vmem:[%s1187_s5] sm:$0x3]  ;;  %s1046_s5 = smov [#allocation11]  }
  0x7e   :  { %397 = vmatprep.subr.bf16.mxu1 %v823_v24  ;;  %v212_v24 = vrot.slane %v207_v23, %v103_v4 }
  0x80   :  { %641 = vmatpush1.bf16.msra.mxu0 %v862_v51 }
  0x81   :  { %398 = vmatpush1.bf16.msra.mxu1 %v825_v25  ;;  %642 = vmatprep.subr.bf16.mxu0 %v867_v52  ;;  %v216_v25 = vrot.slane %v207_v23, %v107_v6  ;;  %v688_v52 = vand.u32 127, %v101_v2 }
  0x82   :  { %399 = vmatprep.subr.bf16.mxu1 %v826_v26 }
  0x83   :  { %vm689_vm2 = vcmp.lt.s32.totalorder %v688_v52, 4  ;;  %vm695_vm3 = vcmp.eq.s32.totalorder %v688_v52, 4 }
  0x84   :  { %643 = vmatpush1.bf16.msra.mxu0 %v865_v53 }
  0x85   :  { %400 = vmatpush1.bf16.msra.mxu1 %v828_v27  ;;  %644 = vmatprep.subr.bf16.mxu0 %v870_v54 }
  0x86   :  { %401 = vmatprep.subr.bf16.mxu1 %v829_v28 }
  0x88   :  { %645 = vmatpush1.bf16.msra.mxu0 %v868_v55 }
  0x89   :  { %402 = vmatpush1.bf16.msra.mxu1 %v831_v29  ;;  %646 = vmatprep.subr.bf16.mxu0 %v873_v56 }
  0x8a   :  { %403 = vmatprep.subr.bf16.mxu1 %v832_v30 }
  0x8c   :  { %647 = vmatpush1.bf16.msra.mxu0 %v871_v57 }
  0x8d   :  { %404 = vmatpush1.bf16.msra.mxu1 %v834_v31  ;;  %648 = vmatprep.subr.bf16.mxu0 %v876_v58 }
  0x8e   :  { %405 = vmatprep.subr.bf16.mxu1 %v835_v32 }
  0x90   :  { %649 = vmatpush1.bf16.msra.mxu0 %v874_v59  ;;  %v677_v59 = vmul.f32 -0.5, %v673_v48 }
  0x91   :  { %406 = vmatpush1.bf16.msra.mxu1 %v837_v33  ;;  %650 = vmatprep.subr.bf16.mxu0 %v879_v60 }
  0x92   :  { %407 = vmatprep.subr.bf16.mxu1 %v838_v34  ;;  %v678_v60 = vmul.f32 %v677_v59, %v673_v48 }
  0x94   :  { %651 = vmatpush1.bf16.msra.mxu0 %v877_v61 }
  0x95   :  { %408 = vmatpush1.bf16.msra.mxu1 %v840_v35  ;;  %652 = vmatprep.subr.bf16.mxu0 %v882_v62 }
  0x96   :  { %409 = vmatprep.subr.bf16.mxu1 %v841_v36  ;;  %v456_v36 = vld [vmem:[%s1189_s7] sm:$0x3]  ;;  %s704_s7 = sshll.u32 %s1046_s5, 4  ;;  %s705_s7 = int_to_ptr.vmem [resolvable:$true] %s704_s7 }
  0x97   :  { %v461_v46 = vrot.slane %v456_v36, %v103_v4  ;;  %s1008_s22 = scalar_lea.vmem %s705_s7, 128  ;;  %p1013_p13 = scmp.lt.s32.totalorder %s705_s7, %s705_s7 }
  0x98   :  { %653 = vmatpush1.bf16.msra.mxu0 %v880_v63  ;;  %p1009_p12 = scmp.ne.s32.totalorder %s705_s7, %s1008_s22  ;;  %p1014_p0 = scmp.lt.s32.totalorder %s1008_s22, %s1008_s22 }
  0x99   :  { %410 = vmatpush1.bf16.msra.mxu1 %v843_v37  ;;  %654 = vmatprep.subr.bf16.mxu0 %v885_v0  ;;  %v465_v37 = vrot.slane %v456_v36, %v107_v6 }
  0x9a   :  { %p1015_p1 = por %p1014_p0, %p1013_p13 }
  0x9c   :  { %655 = vmatpush1.bf16.msra.mxu0 %v883_v1  ;;  %p1016_p2 = pnand %p1015_p1, %p1009_p12 }
  0x9d   :  { %656 = vmatprep.subr.bf16.mxu0 %v888_v19 }
  0xa0   :  { %657 = vmatpush1.bf16.msra.mxu0 %v886_v20 }
  0xa1   :  { %658 = vmatprep.subr.bf16.mxu0 %v891_v21 }
  0xa4   :  { %659 = vmatpush1.bf16.msra.mxu0 %v889_v22 }
 0x132   :  { %v164_v9 = vpop.f32.mrb[0].mxu0 }
 0x133   :  { %v165_v10 = vadd.f32 %v164_v9, %v104_v7  ;;  %v166_v11 = vpop.f32.mrb[1].mxu0 }
 0x134   :  { %v167_v12 = vadd.f32 %v166_v11, %v108_v8  ;;  %v168_v13 = vpop.f32.mrb[2].mxu0 }
 0x135   :  { %v171_v14 = vmax.f32 %v165_v10, 0.0  ;;  %v169_v15 = vpop.f32.mrb[3].mxu0 }
 0x136   :  { %v172_v16 = vmax.f32 %v167_v12, 0.0 }
 0x137   :  { %v173_v18 = vpack.c.bf16 %v171_v14, %v171_v14 }
 0x138   :  { %v174_v17 = vpack.c.bf16 %v172_v16, %v172_v16 }
 0x13a   :  { %411 = vmatprep.mubr.bf16.mxu1 %v174_v17 }
 0x13b   :  { %412 = vmatmul.mubr.bf16.vlgmr.msra.gmra.mrb[0].mxu1 %v173_v18 }
 0x20e   :  { %v413_v26 = vpop.f32.mrb[0].mxu1 }
 0x20f   :  { %v414_v27 = vadd.f32 %v413_v26, %v212_v24  ;;  %v415_v28 = vpop.f32.mrb[1].mxu1 }
 0x210   :  { %v416_v29 = vadd.f32 %v415_v28, %v216_v25  ;;  %v417_v30 = vpop.f32.mrb[2].mxu1 }
 0x211   :  { %v420_v31 = vmax.f32 %v414_v27, 0.0  ;;  %v418_v32 = vpop.f32.mrb[3].mxu1 }
 0x212   :  { %v421_v33 = vmax.f32 %v416_v29, 0.0 }
 0x213   :  { %v422_v35 = vpack.c.bf16 %v420_v31, %v420_v31 }
 0x214   :  { %v423_v34 = vpack.c.bf16 %v421_v33, %v421_v33 }
 0x216   :  { %660 = vmatprep.mubr.bf16.mxu0 %v423_v34 }
 0x217   :  { %661 = vmatmul.mubr.bf16.vlgmr.msra.gmra.mrb[4].mxu0 %v422_v35 }
 0x2ea   :  { %v662_v38 = vpop.f32.mrb[4].mxu0 }
 0x2eb   :  { %v664_v39 = vpop.f32.mrb[5].mxu0  ;;  %v663_v49 = vadd.f32 %v662_v38, %v461_v46 }
 0x2ec   :  { %v665_v40 = vadd.f32 %v664_v39, %v465_v37  ;;  %v666_v41 = vpop.f32.mrb[6].mxu0 }
 0x2ed   :  { %v667_v42 = vpop.f32.mrb[7].mxu0 }
 0x2ee   :  { %v669_v43 = vmax.f32 %v665_v40, -20.0 }
 0x2f0   :  { %v670_v44 = vmin.f32 %v669_v43, 2.0 }
 0x2f2   :  { %v671_v45 = vmul.f32 1.442695, %v670_v44  ;;  %v679_v61 = vsub.f32 %v678_v60, %v670_v44 }
 0x2f4   :  { %892 = vpow2.f32 %v671_v45  ;;  %v783_v63 = vadd.f32 -0.9189385, %v679_v61 }
 0x2fe   :  { %v893_v47 = vpop.eup %892 }
 0x2ff   :  { %v674_v50 = vmul.f32 %v893_v47, %v673_v48 }
 0x301   :  { %v675_v51 = vadd.f32 %v674_v50, %v663_v49 }
 0x303   :  { %894 = vtanh.f32 %v675_v51 }
 0x30d   :  { %v895_v53 = vpop.eup %894 }
 0x30e   :  { %v681_v54 = vmul.f32 %v895_v53, %v895_v53  ;;  %v693_v55 = vmul.f32 2.0, %v895_v53 }
 0x310   :  { %v682_v56 = vsub.f32 1.0, %v681_v54  ;;  %v694_v57 = vsel %vm689_vm2, %v693_v55, 0.0 }
 0x312   :  { %v683_v58 = vadd.f32 1e-06, %v682_v56 }
 0x314   :  { %896 = vlog2.f32 %v683_v58 }
 0x31e   :  { %v897_v62 = vpop.eup %896 }
 0x31f   :  { %v685_v0 = vmul.f32 0.6931472, %v897_v62 }
 0x321   :  { %v686_v1 = vsub.f32 %v783_v63, %v685_v0 }
 0x323   :  { %v690_v3 = vsel %vm689_vm2, %v686_v1, 0.0 }
 0x324   :  { %691 = vadd.xlane.f32.xlu0 %v690_v3 }
 0x3b1   :  { %v692_v2 = vpop.xlane.xlu0 %691 }
 0x3b2   :  { %v696_v4 = vsel %vm695_vm3, %v692_v2, %v694_v57 }
 0x3b3   :  { %697 = vst [vmem:[#allocation11] sm:$0xff] %v696_v4 }
 0x3b4   :  { %1019 = shalt.err (!%p1016_p2)
}
 0x3b5   :  { %s1020_s25 = scalar_lea.hbm %s1190_s8, 128 }
 0x3b6   :  { %p1021_p3 = scmp.ne.s32.totalorder %s1190_s8, %s1020_s25  ;;  %p1024_p4 = scmp.lt.u32.totalorder %s1020_s25, %s1190_s8 }
 0x3b8   :  { %p1026_p5 = pnand %p1024_p4, %p1021_p3 }
 0x3ba   :  { %1029 = shalt.err (!%p1026_p5)
}
 0x3bb   :  { %707 = dma.vmem_to_hbm [thread:$0]  %s705_s7, 128, %s1190_s8, [#allocation4]  }
 0x3bc   :  { %1036 = dma.done.wait [#allocation4], 128  }
 0x3bd   :  { %1037 = vsyncadd [#allocation4], 4294967168 }
 0x3be   :  { %711 = vsyncpa [#allocation3], 1 }
 0x3bf   :  { %712 = vsyncpa [#allocation6], 1 }
 0x3c0   :  { %713 = vsyncpa [#allocation9], 1 }
 0x3c1   :  { %714 = vsyncpa [#allocation4], 1 }

</bundles_post_ra>
